<compile_context>
chip_gen: v5e
topology: v5e:2x2
jax: 0.10.0
libtpu: 0.0.40
codegen_flags: <defaults>
</compile_context>

<pallas_src>
import jax
import jax.numpy as jnp
from jax.experimental import pallas as pl
from jax.experimental.pallas import tpu as pltpu


def _round_up(x, m):
    return (x + m - 1) // m * m


def final_layer_kernel(x_ref, w_ref, b_ref, cs_ref, o_ref):
    # x_ref: (TN, H) model dtype; w_ref: (H, P) matmul dtype;
    # b_ref, cs_ref: (1, P) f32; o_ref: (TN, P) model dtype.
    x = x_ref[...]
    xf = x.astype(jnp.float32)

    # Row statistics in f32 (biased variance + eps=1e-6, matching torch LayerNorm).
    mean = jnp.mean(xf, axis=-1, keepdims=True)                     # (TN, 1)
    var = jnp.mean(xf * xf, axis=-1, keepdims=True) - mean * mean   # (TN, 1)
    var = jnp.maximum(var, 0.0)                                     # cancellation guard
    r = jax.lax.rsqrt(var + 1e-6)                                   # (TN, 1)

    # Raw matmul on the MXU: model-dtype operands, f32 accumulation.
    y = jnp.dot(x.astype(w_ref.dtype), w_ref[...],
                preferred_element_type=jnp.float32)                 # (TN, P)

    # LayerNorm epilogue on the narrow output tile:
    #   ((x - mean) * r) @ Wf == r * (x @ Wf - mean * colsum(Wf))
    y = (y - mean * cs_ref[...]) * r + b_ref[...]
    o_ref[...] = y.astype(o_ref.dtype)


def final_layer(x, gamma, beta, weight, bias, *, block_rows=None,
                force_bf16_matmul=False):
    """FinalLayer forward: Linear(LayerNorm(x, eps=1e-6)).

    x: (B, S, H); gamma/beta: (H,); weight: (P, H) (PyTorch layout); bias: (P,).
    Returns (B, S, P).
    """
    B, S, H = x.shape
    P = weight.shape[0]
    N = B * S
    f32 = jnp.float32

    # ---- Host-side precompute (zero in-kernel cost) ----------------------
    # Fold the LN affine into the linear:
    #   (xn*gamma + beta) @ W.T + b == xn @ (gamma[:,None]*W.T) + (beta@W.T + b)
    w_folded = gamma.astype(f32)[:, None] * weight.astype(f32).T          # (H, P)
    b_folded = (beta.astype(f32) @ weight.astype(f32).T
                + bias.astype(f32)).reshape(1, P)                         # (1, P)

    # Matmul dtype: bf16-native when x is bf16; optionally force bf16 for f32
    # activations (review item; off by default to keep f32 bit-accuracy).
    matmul_dtype = x.dtype
    if force_bf16_matmul and x.dtype == jnp.float32:
        matmul_dtype = jnp.bfloat16
    w_folded = w_folded.astype(matmul_dtype)
    # Column sums of the weight actually fed to the MXU (for the LN epilogue).
    colsum_w = jnp.sum(w_folded.astype(f32), axis=0).reshape(1, P)        # (1, P)

    # ---- Generation-aware tiling -----------------------------------------
    try:
        vmem_cap = int(pltpu.get_tpu_info().vmem_capacity_bytes)
    except Exception:
        vmem_cap = 64 << 20                       # conservative (v7x per-TC)
    if block_rows is None:
        block_rows = 2048 if vmem_cap >= (96 << 20) else 1024   # v5e/v6e vs v7x
    block_rows = max(8, _round_up(block_rows, 8))

    # Keep >= 2 grid steps when N allows it so both v7x TensorCores get work.
    TN = min(block_rows, max(8, _round_up(pl.cdiv(N, 8), 8)))

    x_isz = jnp.dtype(x.dtype).itemsize
    w_isz = jnp.dtype(matmul_dtype).itemsize

    def vmem_est(tn):
        return (2 * tn * H * x_isz              # double-buffered x row tiles
                + 2 * tn * P * x_isz            # double-buffered output tiles
                + H * P * w_isz + 2 * P * 4     # resident weight / bias / colsum
                + 2 * tn * H * 4                # f32 row-statistic intermediates
                + tn * P * 4 + 4 * tn * 4)      # f32 epilogue temporaries

    vmem_budget = int(0.75 * vmem_cap)          # leave headroom (48 MiB on v7x)
    while vmem_est(TN) + (2 << 20) > vmem_budget and TN > 8:
        TN = max(8, _round_up(TN // 2, 8))

    grid = (pl.cdiv(N, TN),)
    x2 = x.reshape(N, H)                        # free reshape, no padding pass

    cost = pl.CostEstimate(
        flops=2 * N * H * P,
        transcendentals=N,                      # one rsqrt per row
        bytes_accessed=(N * H * x_isz + H * P * w_isz + 2 * P * 4
                        + N * P * x_isz),
    )
    vmem_bytes = int(min(max(vmem_est(TN) + (2 << 20), 16 << 20), vmem_budget))

    def build(resident_mode):
        extra = {} if resident_mode is None else {"pipeline_mode": resident_mode}
        return pl.pallas_call(
            final_layer_kernel,
            out_shape=jax.ShapeDtypeStruct((N, P), x.dtype),
            grid_spec=pltpu.PrefetchScalarGridSpec(
                num_scalar_prefetch=0,
                grid=grid,
                in_specs=[
                    pl.BlockSpec((TN, H), lambda i: (i, 0)),            # x row tile
                    pl.BlockSpec((H, P), lambda i: (0, 0), **extra),    # weight
                    pl.BlockSpec((1, P), lambda i: (0, 0), **extra),    # folded bias
                    pl.BlockSpec((1, P), lambda i: (0, 0), **extra),    # colsum(W)
                ],
                out_specs=pl.BlockSpec((TN, P), lambda i: (i, 0)),
            ),
            compiler_params=pltpu.CompilerParams(
                dimension_semantics=("parallel",),
                vmem_limit_bytes=vmem_bytes,
            ),
            cost_estimate=cost,
        )

    try:
        # Constant-index-map operands don't need double buffering.
        out = build(pl.Buffered(1))(x2, w_folded, b_folded, colsum_w)
    except Exception:
        out = build(None)(x2, w_folded, b_folded, colsum_w)

    return out.reshape(B, S, P)


if __name__ == "__main__":
    B, S, H, P = 2, 8, 32, 16   # batch, seq, hidden_size, patch_size

    key = jax.random.PRNGKey(0)
    kx, kg, kbeta, kw, kb = jax.random.split(key, 5)

    x = jax.random.normal(kx, (B, S, H), dtype=jnp.float32)

    # Parameter shapes match nn.LayerNorm(H) and nn.Linear(H, P); non-trivial
    # gamma/beta so the affine fold is actually exercised.
    gamma = 1.0 + 0.1 * jax.random.normal(kg, (H,), dtype=jnp.float32)
    beta = 0.1 * jax.random.normal(kbeta, (H,), dtype=jnp.float32)
    bound = 1.0 / (H ** 0.5)
    weight = jax.random.uniform(kw, (P, H), minval=-bound, maxval=bound,
                                dtype=jnp.float32)   # Linear weight (out, in)
    bias = jax.random.uniform(kb, (P,), minval=-bound, maxval=bound,
                              dtype=jnp.float32)     # Linear bias

    out = final_layer(x, gamma, beta, weight, bias)
    jax.block_until_ready(out)

    # Plain-JAX reference (two-pass LayerNorm, explicit affine, then linear).
    mean = jnp.mean(x, axis=-1, keepdims=True)
    var = jnp.mean((x - mean) ** 2, axis=-1, keepdims=True)
    xn = (x - mean) * jax.lax.rsqrt(var + 1e-6) * gamma + beta
    ref = jnp.einsum("bsh,ph->bsp", xn, weight) + bias

    assert out.shape == (B, S, P)
    err = float(jnp.max(jnp.abs(out - ref)))
    assert jnp.allclose(out, ref, atol=2e-5, rtol=2e-5), f"max abs err = {err}"
    print("KERNEL_OK")
</pallas_src>

<mosaic_0001>
module attributes {stable_mosaic.version = 11 : i64} {
  func.func @final_layer_kernel(%arg0: i32, %arg1: memref<8x32xf32, #tpu.memory_space<vmem>>, %arg2: memref<32x16xf32, #tpu.memory_space<vmem>>, %arg3: memref<1x16xf32, #tpu.memory_space<vmem>>, %arg4: memref<1x16xf32, #tpu.memory_space<vmem>>, %arg5: memref<8x16xf32, #tpu.memory_space<vmem>>) attributes {dimension_semantics = [#tpu.dimension_semantics<parallel>], iteration_bounds = array<i64: 2>, scalar_prefetch = 0 : i64, scratch_operands = 0 : i64, tpu.core_type = #tpu.core_type<tc>, window_params = [{transform_indices = @transform_0, window_bounds = array<i64: 8, 32>}, {pipeline_mode = #tpu.pipeline_mode<synchronous>, transform_indices = @transform_1, window_bounds = array<i64: 32, 16>}, {pipeline_mode = #tpu.pipeline_mode<synchronous>, transform_indices = @transform_2, window_bounds = array<i64: 1, 16>}, {pipeline_mode = #tpu.pipeline_mode<synchronous>, transform_indices = @transform_3, window_bounds = array<i64: 1, 16>}, {transform_indices = @transform_4, window_bounds = array<i64: 8, 16>}]} {
    %c0 = arith.constant 0 : index
    %c0_0 = arith.constant 0 : index
    %0 = vector.load %arg1[%c0, %c0_0] : memref<8x32xf32, #tpu.memory_space<vmem>>, vector<8x32xf32>
    %cst = arith.constant dense<0.000000e+00> : vector<8xf32>
    %1 = vector.multi_reduction <add>, %0, %cst [1] : vector<8x32xf32> to vector<8xf32>
    %2 = vector.shape_cast %1 : vector<8xf32> to vector<8x1xf32>
    %cst_1 = arith.constant 3.200000e+01 : f32
    %3 = vector.broadcast %cst_1 : f32 to vector<8x1xf32>
    %4 = arith.divf %2, %3 : vector<8x1xf32>
    %5 = arith.mulf %0, %0 : vector<8x32xf32>
    %cst_2 = arith.constant dense<0.000000e+00> : vector<8xf32>
    %6 = vector.multi_reduction <add>, %5, %cst_2 [1] : vector<8x32xf32> to vector<8xf32>
    %7 = vector.shape_cast %6 : vector<8xf32> to vector<8x1xf32>
    %cst_3 = arith.constant 3.200000e+01 : f32
    %8 = vector.broadcast %cst_3 : f32 to vector<8x1xf32>
    %9 = arith.divf %7, %8 : vector<8x1xf32>
    %10 = arith.mulf %4, %4 : vector<8x1xf32>
    %11 = arith.subf %9, %10 : vector<8x1xf32>
    %cst_4 = arith.constant 0.000000e+00 : f32
    %12 = vector.broadcast %cst_4 : f32 to vector<8x1xf32>
    %13 = arith.maximumf %11, %12 : vector<8x1xf32>
    %cst_5 = arith.constant 9.99999997E-7 : f32
    %14 = vector.broadcast %cst_5 : f32 to vector<8x1xf32>
    %15 = arith.addf %13, %14 : vector<8x1xf32>
    %16 = math.rsqrt %15 : vector<8x1xf32>
    %c0_6 = arith.constant 0 : index
    %c0_7 = arith.constant 0 : index
    %17 = vector.load %arg2[%c0_6, %c0_7] : memref<32x16xf32, #tpu.memory_space<vmem>>, vector<32x16xf32>
    %cst_8 = arith.constant dense<0.000000e+00> : vector<8x16xf32>
    %18 = tpu.matmul %0, %17, %cst_8 {dimension_numbers = #tpu.dot_dimension_numbers<[1], [0], [0], [1], [0, 0, 1, 1], [], []>} : vector<8x32xf32>, vector<32x16xf32>, vector<8x16xf32> -> vector<8x16xf32>
    %c0_9 = arith.constant 0 : index
    %c0_10 = arith.constant 0 : index
    %19 = vector.load %arg4[%c0_9, %c0_10] : memref<1x16xf32, #tpu.memory_space<vmem>>, vector<1x16xf32>
    %20 = vector.broadcast %4 : vector<8x1xf32> to vector<8x16xf32>
    %21 = vector.broadcast %19 : vector<1x16xf32> to vector<8x16xf32>
    %22 = arith.mulf %20, %21 : vector<8x16xf32>
    %23 = arith.subf %18, %22 : vector<8x16xf32>
    %24 = vector.broadcast %16 : vector<8x1xf32> to vector<8x16xf32>
    %25 = arith.mulf %23, %24 : vector<8x16xf32>
    %c0_11 = arith.constant 0 : index
    %c0_12 = arith.constant 0 : index
    %26 = vector.load %arg3[%c0_11, %c0_12] : memref<1x16xf32, #tpu.memory_space<vmem>>, vector<1x16xf32>
    %27 = vector.broadcast %26 : vector<1x16xf32> to vector<8x16xf32>
    %28 = arith.addf %25, %27 : vector<8x16xf32>
    %c0_13 = arith.constant 0 : index
    %c0_14 = arith.constant 0 : index
    %29 = vector.load %arg5[%c0_13, %c0_14] : memref<8x16xf32, #tpu.memory_space<vmem>>, vector<8x16xf32>
    tpu.vector_store %arg5[%c0_13, %c0_14], %28 {strides = array<i32>} : memref<8x16xf32, #tpu.memory_space<vmem>>, vector<8x16xf32>,
    return
  }
  func.func @transform_0(%arg0: i32) -> (i32, i32) {
    %c0_i32 = arith.constant 0 : i32
    %c0_i32_0 = arith.constant 0 : i32
    return %arg0, %c0_i32 : i32, i32
  }
  func.func @transform_1(%arg0: i32) -> (i32, i32) {
    %c0_i32 = arith.constant 0 : i32
    %c0_i32_0 = arith.constant 0 : i32
    %c0_i32_1 = arith.constant 0 : i32
    return %c0_i32, %c0_i32_0 : i32, i32
  }
  func.func @transform_2(%arg0: i32) -> (i32, i32) {
    %c0_i32 = arith.constant 0 : i32
    %c0_i32_0 = arith.constant 0 : i32
    %c0_i32_1 = arith.constant 0 : i32
    return %c0_i32, %c0_i32_0 : i32, i32
  }
  func.func @transform_3(%arg0: i32) -> (i32, i32) {
    %c0_i32 = arith.constant 0 : i32
    %c0_i32_0 = arith.constant 0 : i32
    %c0_i32_1 = arith.constant 0 : i32
    return %c0_i32, %c0_i32_0 : i32, i32
  }
  func.func @transform_4(%arg0: i32) -> (i32, i32) {
    %c0_i32 = arith.constant 0 : i32
    %c0_i32_0 = arith.constant 0 : i32
    return %arg0, %c0_i32 : i32, i32
  }
}

module attributes {stable_mosaic.version = 11 : i64} {
  func.func @final_layer_kernel(%arg0: i32, %arg1: memref<8x32xf32, #tpu.memory_space<vmem>>, %arg2: memref<32x16xf32, #tpu.memory_space<vmem>>, %arg3: memref<1x16xf32, #tpu.memory_space<vmem>>, %arg4: memref<1x16xf32, #tpu.memory_space<vmem>>, %arg5: memref<8x16xf32, #tpu.memory_space<vmem>>) attributes {dimension_semantics = [#tpu.dimension_semantics<parallel>], iteration_bounds = array<i64: 2>, scalar_prefetch = 0 : i64, scratch_operands = 0 : i64, tpu.core_type = #tpu.core_type<tc>, window_params = [{transform_indices = @transform_0, window_bounds = array<i64: 8, 32>}, {pipeline_mode = #tpu.pipeline_mode<synchronous>, transform_indices = @transform_1, window_bounds = array<i64: 32, 16>}, {pipeline_mode = #tpu.pipeline_mode<synchronous>, transform_indices = @transform_2, window_bounds = array<i64: 1, 16>}, {pipeline_mode = #tpu.pipeline_mode<synchronous>, transform_indices = @transform_3, window_bounds = array<i64: 1, 16>}, {transform_indices = @transform_4, window_bounds = array<i64: 8, 16>}]} {
    %c0 = arith.constant 0 : index
    %c0_0 = arith.constant 0 : index
    %0 = vector.load %arg1[%c0, %c0_0] : memref<8x32xf32, #tpu.memory_space<vmem>>, vector<8x32xf32>
    %cst = arith.constant dense<0.000000e+00> : vector<8xf32>
    %1 = vector.multi_reduction <add>, %0, %cst [1] : vector<8x32xf32> to vector<8xf32>
    %2 = vector.shape_cast %1 : vector<8xf32> to vector<8x1xf32>
    %cst_1 = arith.constant 3.200000e+01 : f32
    %3 = vector.broadcast %cst_1 : f32 to vector<8x1xf32>
    %4 = arith.divf %2, %3 : vector<8x1xf32>
    %5 = arith.mulf %0, %0 : vector<8x32xf32>
    %cst_2 = arith.constant dense<0.000000e+00> : vector<8xf32>
    %6 = vector.multi_reduction <add>, %5, %cst_2 [1] : vector<8x32xf32> to vector<8xf32>
    %7 = vector.shape_cast %6 : vector<8xf32> to vector<8x1xf32>
    %cst_3 = arith.constant 3.200000e+01 : f32
    %8 = vector.broadcast %cst_3 : f32 to vector<8x1xf32>
    %9 = arith.divf %7, %8 : vector<8x1xf32>
    %10 = arith.mulf %4, %4 : vector<8x1xf32>
    %11 = arith.subf %9, %10 : vector<8x1xf32>
    %cst_4 = arith.constant 0.000000e+00 : f32
    %12 = vector.broadcast %cst_4 : f32 to vector<8x1xf32>
    %13 = arith.maximumf %11, %12 : vector<8x1xf32>
    %cst_5 = arith.constant 9.99999997E-7 : f32
    %14 = vector.broadcast %cst_5 : f32 to vector<8x1xf32>
    %15 = arith.addf %13, %14 : vector<8x1xf32>
    %16 = math.rsqrt %15 : vector<8x1xf32>
    %c0_6 = arith.constant 0 : index
    %c0_7 = arith.constant 0 : index
    %17 = vector.load %arg2[%c0_6, %c0_7] : memref<32x16xf32, #tpu.memory_space<vmem>>, vector<32x16xf32>
    %cst_8 = arith.constant dense<0.000000e+00> : vector<8x16xf32>
    %18 = tpu.matmul %0, %17, %cst_8 {dimension_numbers = #tpu.dot_dimension_numbers<[1], [0], [0], [1], [0, 0, 1, 1], [], []>} : vector<8x32xf32>, vector<32x16xf32>, vector<8x16xf32> -> vector<8x16xf32>
    %c0_9 = arith.constant 0 : index
    %c0_10 = arith.constant 0 : index
    %19 = vector.load %arg4[%c0_9, %c0_10] : memref<1x16xf32, #tpu.memory_space<vmem>>, vector<1x16xf32>
    %20 = vector.broadcast %4 : vector<8x1xf32> to vector<8x16xf32>
    %21 = vector.broadcast %19 : vector<1x16xf32> to vector<8x16xf32>
    %22 = arith.mulf %20, %21 : vector<8x16xf32>
    %23 = arith.subf %18, %22 : vector<8x16xf32>
    %24 = vector.broadcast %16 : vector<8x1xf32> to vector<8x16xf32>
    %25 = arith.mulf %23, %24 : vector<8x16xf32>
    %c0_11 = arith.constant 0 : index
    %c0_12 = arith.constant 0 : index
    %26 = vector.load %arg3[%c0_11, %c0_12] : memref<1x16xf32, #tpu.memory_space<vmem>>, vector<1x16xf32>
    %27 = vector.broadcast %26 : vector<1x16xf32> to vector<8x16xf32>
    %28 = arith.addf %25, %27 : vector<8x16xf32>
    %c0_13 = arith.constant 0 : index
    %c0_14 = arith.constant 0 : index
    %29 = vector.load %arg5[%c0_13, %c0_14] : memref<8x16xf32, #tpu.memory_space<vmem>>, vector<8x16xf32>
    tpu.vector_store %arg5[%c0_13, %c0_14], %28 {strides = array<i32>} : memref<8x16xf32, #tpu.memory_space<vmem>>, vector<8x16xf32>,
    return
  }
  func.func @transform_0(%arg0: i32) -> (i32, i32) {
    %c0_i32 = arith.constant 0 : i32
    %c0_i32_0 = arith.constant 0 : i32
    return %arg0, %c0_i32 : i32, i32
  }
  func.func @transform_1(%arg0: i32) -> (i32, i32) {
    %c0_i32 = arith.constant 0 : i32
    %c0_i32_0 = arith.constant 0 : i32
    %c0_i32_1 = arith.constant 0 : i32
    return %c0_i32, %c0_i32_0 : i32, i32
  }
  func.func @transform_2(%arg0: i32) -> (i32, i32) {
    %c0_i32 = arith.constant 0 : i32
    %c0_i32_0 = arith.constant 0 : i32
    %c0_i32_1 = arith.constant 0 : i32
    return %c0_i32, %c0_i32_0 : i32, i32
  }
  func.func @transform_3(%arg0: i32) -> (i32, i32) {
    %c0_i32 = arith.constant 0 : i32
    %c0_i32_0 = arith.constant 0 : i32
    %c0_i32_1 = arith.constant 0 : i32
    return %c0_i32, %c0_i32_0 : i32, i32
  }
  func.func @transform_4(%arg0: i32) -> (i32, i32) {
    %c0_i32 = arith.constant 0 : i32
    %c0_i32_0 = arith.constant 0 : i32
    return %arg0, %c0_i32 : i32, i32
  }
}

</mosaic_0001>

<bundles_post_ra>
// kernel: tpu_custom_call.1
= control target key start
LH: loop header
LB: loop body
LE: loop exit
PB: predicated region body
PF: predicated region fallthrough
CT: control target
= control target key end

     0   :  { %9 = vsyncpa [#allocation3], 0  ;;  %s591_s0 = inlined_call_operand.vmem [shape: f32[16,32], index: 0, kind: input, shape index: {}]   ;;  %s592_s1 = inlined_call_operand.vmem [shape: f32[32,16], index: 1, kind: input, shape index: {}]   ;;  %s593_s2 = inlined_call_operand.vmem [shape: f32[1,16], index: 2, kind: input, shape index: {}]   ;;  %s594_s3 = inlined_call_operand.vmem [shape: f32[1,16], index: 3, kind: input, shape index: {}]   ;;  %s595_s4 = inlined_call_operand.hbm [shape: f32[16,16], index: 4, kind: output, shape index: {}]  }
   0x1   :  { %11 = vsyncpa [#allocation3 + $0x1], 0  ;;  %s488_s15 = smov 0   ;;  %s490_s16 = smov 0  }
   0x2   :  { %s492_s17 = smov 0   ;;  %s494_s18 = smov 0  }
   0x3 LB: > { %s509_s19 = sadd.s32 4294967295, %s460_s18   ;;  %s341_s20 = sadd.s32 4294967294, %s460_s18   ;;  %s460_s18 = sphi %s494_s18, %s601_s18   ;;  %s456_s17 = sphi %s492_s17, %s600_s17   ;;  %s452_s16 = sphi %s490_s16, %s599_s16   ;;  %s448_s15 = sphi %s488_s15, %s598_s15  }
   0x4   : > { %s513_s21 = sadd.s32 1, %s460_s18   ;;  %s113_s22 = sadd.s32 1, %s456_s17 }
   0x5   : > { %s110_s23 = ssub.s32 %s460_s18, %s513_s21  ;;  %p123_p0 = scmp.ne.s32.totalorder %s456_s17, %s452_s16 }
   0x6   : > { %p111_p1 = scmp.eq.s32.totalorder %s110_s23, 0  ;;  %p124_p2 = scmp.eq.s32.totalorder %s509_s19, 1 }
   0x7   : > { %p129_p3 = scmp.ne.s32.totalorder %s452_s16, %s448_s15  ;;  %p130_p4 = scmp.eq.s32.totalorder %s341_s20, 1 }
   0x8   : > { %s524_s24 = scalar_select %p111_p1, %s456_s17, %s113_s22  }
   0x9   : > { %p526_p5 = por %p124_p2, %p123_p0  ;;  %p530_p6 = por %p130_p4, %p129_p3 }
   0xa   : > { %p344_p7 = scmp.ge.s32.totalorder %s460_s18, 1  ;;  %p164_p8 = scmp.lt.s32.totalorder %s460_s18, 3 }
   0xc   : > { %p165_p9 = pnand %p344_p7, %p164_p8 }
   0xd   : > { %p189_p10 = scmp.lt.s32.totalorder (!%p165_p9), %s509_s19, 1  ;;  %s186_s14 = sand.u32 (!%p165_p9), 1, %s452_s16  }
   0xe   : > { %168 = sbr.rel (%p165_p9) target bundleno = 182 (0xb6), region = 36  ;;  %s345_s23 = sshll.u32 (!%p165_p9), %s186_s14, 3 }
   0xf   : > { %s349_s27 = sshll.u32 (!%p165_p9), %s509_s19, 3  ;;  %s267_s9 = scalar_lea.sflag (!%p165_p9), [#allocation3], %s186_s14 }
  0x10   : > { %s277_s30 = scalar_lea.hbm (!%p165_p9), %s595_s4, %s349_s27  ;;  %s418_s20 = scalar_lea.hbm (!%p165_p9), %s595_s4, 16 }
  0x11   : > { %s281_s8 = sshll.u32 (!%p165_p9), %s277_s30, 4  ;;  %s282_s8 = int_to_ptr.hbm [resolvable:$true] %s281_s8 }
  0x13   : > { %v228_v0 = vld [vmem:[%s592_s1 + $0x18] sm:$0xff]  ;;  %v227_v1 = vld [vmem:[%s592_s1 + $0x10] sm:$0xff]  ;;  %v226_v2 = vld [vmem:[%s592_s1 + $0x8] sm:$0xff]  ;;  %s190_s7 = scalar_select %p189_p10, %s509_s19, 1  ;;  %vm194_vm0 = vcmask 261120   ;;  %v462_v8 = vmov 32.0  }
  0x14   : > { %244 = vmatpush.msra.mxu0 %v228_v0  ;;  %v225_v3 = vld [vmem:[%s592_s1] sm:$0xff]  ;;  %394 = vrcp.f32 %v462_v8  ;;  %vm264_vm5 = vcmask 130048  }
  0x15   : > { %s346_s10 = sshll.u32 %s190_s7, 3  ;;  %v392_v26 = vld [vmem:[%s594_s3] ss:$0 sm:$0xff]  ;;  %s188_s7 = scalar_lea.vmem [#allocation2], %s345_s23 }
  0x16   : > { %245 = vmatpush.msra.mxu0 %v227_v1  ;;  %s192_s13 = scalar_lea.vmem %s591_s0, %s346_s10  ;;  %v393_v33 = vld [vmem:[%s593_s2] ss:$0 sm:$0xff]  ;;  %s279_s19 = sshll.u32 %s188_s7, 4  ;;  %s280_s19 = int_to_ptr.vmem [resolvable:$true] %s279_s19 }
  0x17   : > { %v193_v4 = vld [vmem:[%s192_s13] sm:$0xff]  ;;  %s412_s10 = sshra.s32 %s282_s8, 4  ;;  %s413_s10 = int_to_ptr.hbm [resolvable:$true] %s412_s10 }
  0x18   : > { %246 = vmatpush.msra.mxu0 %v226_v2  ;;  %v195_v5 = vsel %vm194_vm0, %v193_v4, 0.0  ;;  %v206_v6 = vmul.f32 %v193_v4, %v193_v4  ;;  %s414_s11 = scalar_lea.hbm %s413_s10, 8  ;;  %p419_p0 = scmp.lt.s32.totalorder %s413_s10, %s595_s4 }
  0x19   : > { %196 = vadd.xlane.f32.xlu0 %v195_v5  ;;  %p415_p11 = scmp.ne.s32.totalorder %s413_s10, %s414_s11  ;;  %p420_p1 = scmp.lt.s32.totalorder %s418_s20, %s414_s11 }
  0x1a   : > { %247 = vmatpush.msra.mxu0 %v225_v3  ;;  %v207_v7 = vsel %vm194_vm0, %v206_v6, 0.0  ;;  %v395_v9 = vpop.eup %394 }
  0x1b   : > { %347 = vmatmul.msk.f32.vlgmr.msra.gmra.mxu0 %vm194_vm0, %v193_v4  ;;  %v199_v10 = vmul.f32 32.0, %v395_v9  ;;  %vm203_vm1 = vweird.f32 %v395_v9  ;;  %p416_p12 = pnand %p415_p11, %p526_p5  ;;  %p421_p2 = por %p420_p1, %p419_p0 }
  0x1d   : > { %v200_v11 = vsub.f32 1.0, %v199_v10  ;;  %p417_p13 = pneg %p416_p12 }
  0x1f   : > { %v201_v12 = vmul.f32 %v395_v9, %v200_v11  ;;  %p422_p3 = pnand %p421_p2, %p417_p13 }
  0x21   : > { %208 = vadd.xlane.f32.xlu0 %v207_v7  ;;  %v202_v13 = vadd.f32 %v395_v9, %v201_v12 }
  0x23   : > { %v204_v15 = vsel %vm203_vm1, %v395_v9, %v202_v13 }
  0x8c   : > { %v197_v14 = vpop.xlane.xlu0 %196 }
  0x8d   : > { %v205_v16 = vmul.f32 %v204_v15, %v197_v14 }
  0x8f   : > { %v211_v18 = vmul.f32 %v205_v16, %v205_v16  ;;  %v256_v30 = vmul.f32 %v392_v26, %v205_v16 }
  0x94   : > { %v209_v17 = vpop.xlane.xlu0 %208 }
  0x95   : > { %v210_v19 = vmul.f32 %v209_v17, %v204_v15 }
  0x97   : > { %v212_v20 = vsub.f32 %v210_v19, %v211_v18 }
  0x98   : > { %v249_v29 = vpop.f32.mrf.mxu0 }
  0x99   : > { %v213_v21 = vmax.f32 %v212_v20, 0.0  ;;  %v257_v32 = vsub.f32 %v249_v29, %v256_v30 }
  0x9b   : > { %v214_v22 = vadd.f32 1e-06, %v213_v21 }
  0x9d   : > { %396 = vrsqrt.f32 %v214_v22  ;;  %vm221_vm3 = vweird.f32 %v214_v22 }
  0xa3   : > { %v397_v23 = vpop.eup %396 }
  0xa4   : > { %v216_v24 = vmul.f32 %v397_v23, %v214_v22  ;;  %vm222_vm2 = vweird.f32 %v397_v23 }
  0xa5   : > { %vm223_vm4 = vmor %vm221_vm3, %vm222_vm2 }
  0xa6   : > { %v217_v25 = vmul.f32 %v397_v23, %v216_v24 }
  0xa8   : > { %v218_v27 = vmul.f32 0.5, %v217_v25 }
  0xaa   : > { %v219_v28 = vsub.f32 1.5, %v218_v27 }
  0xac   : > { %v220_v31 = vmul.f32 %v397_v23, %v219_v28 }
  0xae   : > { %v224_v34 = vsel %vm223_vm4, %v397_v23, %v220_v31 }
  0xaf   : > { %v258_v35 = vmul.f32 %v257_v32, %v224_v34 }
  0xb1   : > { %v263_v36 = vadd.f32 %v393_v33, %v258_v35 }
  0xb3   : > { %265 = vst.msk [vmem:[%s188_s7] sm:$0xff] %vm264_vm5, %v263_v36 }
  0xb4   : > { %425 = shalt.err (!%p422_p3)
}
  0xb5   : > { %352 = dma.vmem_to_hbm [thread:$0]  (%p526_p5), %s280_s19, 128, %s282_s8, %s267_s9  }
  0xb6 PF: > { %p358_p4 = scmp.ge.s32.totalorder %s460_s18, 2  ;;  %s293_s14 = sand.u32 1, %s448_s15  }
  0xb7   : > { %s294_s27 = scalar_lea.sflag [#allocation3], %s293_s14 }
  0xb8   : > { %p355_p7 = pnand %p358_p4, %p530_p6 }
  0xba   : > { %p356_p8 = pneg %p355_p7 }
  0xbc   : > { %443 = dma.done.wait (%p356_p8), %s294_s27, 128  }
  0xbd   : > { %445 = vsyncadd (%p356_p8), %s294_s27, 4294967168  ;;  %p14_p9 = scmp.ge.s32.totalorder %s513_s21, 4   ;;  %s598_s15 = smov %s452_s16 }
  0xbe   : > { %s599_s16 = smov %s456_s17  ;;  %s600_s17 = smov %s524_s24 }
  0xbf   : > { %s601_s18 = smov %s513_s21  ;;  %16 = sbr.rel (!%p14_p9) target bundleno = 3 (0x3), region = 71 }
  0xc4   :  { %300 = vsyncpa [#allocation3], 1 }
  0xc5   :  { %302 = vsyncpa [#allocation3 + $0x1], 1 }

// kernel: tpu_custom_call.1
= control target key start
LH: loop header
LB: loop body
LE: loop exit
PB: predicated region body
PF: predicated region fallthrough
CT: control target
= control target key end

     0   :  { %9 = vsyncpa [#allocation3], 0  ;;  %s591_s0 = inlined_call_operand.vmem [shape: f32[16,32], index: 0, kind: input, shape index: {}]   ;;  %s592_s1 = inlined_call_operand.vmem [shape: f32[32,16], index: 1, kind: input, shape index: {}]   ;;  %s593_s2 = inlined_call_operand.vmem [shape: f32[1,16], index: 2, kind: input, shape index: {}]   ;;  %s594_s3 = inlined_call_operand.vmem [shape: f32[1,16], index: 3, kind: input, shape index: {}]   ;;  %s595_s4 = inlined_call_operand.hbm [shape: f32[16,16], index: 4, kind: output, shape index: {}]  }
   0x1   :  { %11 = vsyncpa [#allocation3 + $0x1], 0  ;;  %s488_s15 = smov 0   ;;  %s490_s16 = smov 0  }
   0x2   :  { %s492_s17 = smov 0   ;;  %s494_s18 = smov 0  }
   0x3 LB: > { %s509_s19 = sadd.s32 4294967295, %s460_s18   ;;  %s341_s20 = sadd.s32 4294967294, %s460_s18   ;;  %s460_s18 = sphi %s494_s18, %s601_s18   ;;  %s456_s17 = sphi %s492_s17, %s600_s17   ;;  %s452_s16 = sphi %s490_s16, %s599_s16   ;;  %s448_s15 = sphi %s488_s15, %s598_s15  }
   0x4   : > { %s513_s21 = sadd.s32 1, %s460_s18   ;;  %s113_s22 = sadd.s32 1, %s456_s17 }
   0x5   : > { %s110_s23 = ssub.s32 %s460_s18, %s513_s21  ;;  %p123_p0 = scmp.ne.s32.totalorder %s456_s17, %s452_s16 }
   0x6   : > { %p111_p1 = scmp.eq.s32.totalorder %s110_s23, 0  ;;  %p124_p2 = scmp.eq.s32.totalorder %s509_s19, 1 }
   0x7   : > { %p129_p3 = scmp.ne.s32.totalorder %s452_s16, %s448_s15  ;;  %p130_p4 = scmp.eq.s32.totalorder %s341_s20, 1 }
   0x8   : > { %s524_s24 = scalar_select %p111_p1, %s456_s17, %s113_s22  }
   0x9   : > { %p526_p5 = por %p124_p2, %p123_p0  ;;  %p530_p6 = por %p130_p4, %p129_p3 }
   0xa   : > { %p344_p7 = scmp.ge.s32.totalorder %s460_s18, 1  ;;  %p164_p8 = scmp.lt.s32.totalorder %s460_s18, 3 }
   0xc   : > { %p165_p9 = pnand %p344_p7, %p164_p8 }
   0xd   : > { %p189_p10 = scmp.lt.s32.totalorder (!%p165_p9), %s509_s19, 1  ;;  %s186_s14 = sand.u32 (!%p165_p9), 1, %s452_s16  }
   0xe   : > { %168 = sbr.rel (%p165_p9) target bundleno = 182 (0xb6), region = 36  ;;  %s345_s23 = sshll.u32 (!%p165_p9), %s186_s14, 3 }
   0xf   : > { %s349_s27 = sshll.u32 (!%p165_p9), %s509_s19, 3  ;;  %s267_s9 = scalar_lea.sflag (!%p165_p9), [#allocation3], %s186_s14 }
  0x10   : > { %s277_s30 = scalar_lea.hbm (!%p165_p9), %s595_s4, %s349_s27  ;;  %s418_s20 = scalar_lea.hbm (!%p165_p9), %s595_s4, 16 }
  0x11   : > { %s281_s8 = sshll.u32 (!%p165_p9), %s277_s30, 4  ;;  %s282_s8 = int_to_ptr.hbm [resolvable:$true] %s281_s8 }
  0x13   : > { %v228_v0 = vld [vmem:[%s592_s1 + $0x18] sm:$0xff]  ;;  %v227_v1 = vld [vmem:[%s592_s1 + $0x10] sm:$0xff]  ;;  %v226_v2 = vld [vmem:[%s592_s1 + $0x8] sm:$0xff]  ;;  %s190_s7 = scalar_select %p189_p10, %s509_s19, 1  ;;  %vm194_vm0 = vcmask 261120   ;;  %v462_v8 = vmov 32.0  }
  0x14   : > { %244 = vmatpush.msra.mxu0 %v228_v0  ;;  %v225_v3 = vld [vmem:[%s592_s1] sm:$0xff]  ;;  %394 = vrcp.f32 %v462_v8  ;;  %vm264_vm5 = vcmask 130048  }
  0x15   : > { %s346_s10 = sshll.u32 %s190_s7, 3  ;;  %v392_v26 = vld [vmem:[%s594_s3] ss:$0 sm:$0xff]  ;;  %s188_s7 = scalar_lea.vmem [#allocation2], %s345_s23 }
  0x16   : > { %245 = vmatpush.msra.mxu0 %v227_v1  ;;  %s192_s13 = scalar_lea.vmem %s591_s0, %s346_s10  ;;  %v393_v33 = vld [vmem:[%s593_s2] ss:$0 sm:$0xff]  ;;  %s279_s19 = sshll.u32 %s188_s7, 4  ;;  %s280_s19 = int_to_ptr.vmem [resolvable:$true] %s279_s19 }
  0x17   : > { %v193_v4 = vld [vmem:[%s192_s13] sm:$0xff]  ;;  %s412_s10 = sshra.s32 %s282_s8, 4  ;;  %s413_s10 = int_to_ptr.hbm [resolvable:$true] %s412_s10 }
  0x18   : > { %246 = vmatpush.msra.mxu0 %v226_v2  ;;  %v195_v5 = vsel %vm194_vm0, %v193_v4, 0.0  ;;  %v206_v6 = vmul.f32 %v193_v4, %v193_v4  ;;  %s414_s11 = scalar_lea.hbm %s413_s10, 8  ;;  %p419_p0 = scmp.lt.s32.totalorder %s413_s10, %s595_s4 }
  0x19   : > { %196 = vadd.xlane.f32.xlu0 %v195_v5  ;;  %p415_p11 = scmp.ne.s32.totalorder %s413_s10, %s414_s11  ;;  %p420_p1 = scmp.lt.s32.totalorder %s418_s20, %s414_s11 }
  0x1a   : > { %247 = vmatpush.msra.mxu0 %v225_v3  ;;  %v207_v7 = vsel %vm194_vm0, %v206_v6, 0.0  ;;  %v395_v9 = vpop.eup %394 }
  0x1b   : > { %347 = vmatmul.msk.f32.vlgmr.msra.gmra.mxu0 %vm194_vm0, %v193_v4  ;;  %v199_v10 = vmul.f32 32.0, %v395_v9  ;;  %vm203_vm1 = vweird.f32 %v395_v9  ;;  %p416_p12 = pnand %p415_p11, %p526_p5  ;;  %p421_p2 = por %p420_p1, %p419_p0 }
  0x1d   : > { %v200_v11 = vsub.f32 1.0, %v199_v10  ;;  %p417_p13 = pneg %p416_p12 }
  0x1f   : > { %v201_v12 = vmul.f32 %v395_v9, %v200_v11  ;;  %p422_p3 = pnand %p421_p2, %p417_p13 }
  0x21   : > { %208 = vadd.xlane.f32.xlu0 %v207_v7  ;;  %v202_v13 = vadd.f32 %v395_v9, %v201_v12 }
  0x23   : > { %v204_v15 = vsel %vm203_vm1, %v395_v9, %v202_v13 }
  0x8c   : > { %v197_v14 = vpop.xlane.xlu0 %196 }
  0x8d   : > { %v205_v16 = vmul.f32 %v204_v15, %v197_v14 }
  0x8f   : > { %v211_v18 = vmul.f32 %v205_v16, %v205_v16  ;;  %v256_v30 = vmul.f32 %v392_v26, %v205_v16 }
  0x94   : > { %v209_v17 = vpop.xlane.xlu0 %208 }
  0x95   : > { %v210_v19 = vmul.f32 %v209_v17, %v204_v15 }
  0x97   : > { %v212_v20 = vsub.f32 %v210_v19, %v211_v18 }
  0x98   : > { %v249_v29 = vpop.f32.mrf.mxu0 }
  0x99   : > { %v213_v21 = vmax.f32 %v212_v20, 0.0  ;;  %v257_v32 = vsub.f32 %v249_v29, %v256_v30 }
  0x9b   : > { %v214_v22 = vadd.f32 1e-06, %v213_v21 }
  0x9d   : > { %396 = vrsqrt.f32 %v214_v22  ;;  %vm221_vm3 = vweird.f32 %v214_v22 }
  0xa3   : > { %v397_v23 = vpop.eup %396 }
  0xa4   : > { %v216_v24 = vmul.f32 %v397_v23, %v214_v22  ;;  %vm222_vm2 = vweird.f32 %v397_v23 }
  0xa5   : > { %vm223_vm4 = vmor %vm221_vm3, %vm222_vm2 }
  0xa6   : > { %v217_v25 = vmul.f32 %v397_v23, %v216_v24 }
  0xa8   : > { %v218_v27 = vmul.f32 0.5, %v217_v25 }
  0xaa   : > { %v219_v28 = vsub.f32 1.5, %v218_v27 }
  0xac   : > { %v220_v31 = vmul.f32 %v397_v23, %v219_v28 }
  0xae   : > { %v224_v34 = vsel %vm223_vm4, %v397_v23, %v220_v31 }
  0xaf   : > { %v258_v35 = vmul.f32 %v257_v32, %v224_v34 }
  0xb1   : > { %v263_v36 = vadd.f32 %v393_v33, %v258_v35 }
  0xb3   : > { %265 = vst.msk [vmem:[%s188_s7] sm:$0xff] %vm264_vm5, %v263_v36 }
  0xb4   : > { %425 = shalt.err (!%p422_p3)
}
  0xb5   : > { %352 = dma.vmem_to_hbm [thread:$0]  (%p526_p5), %s280_s19, 128, %s282_s8, %s267_s9  }
  0xb6 PF: > { %p358_p4 = scmp.ge.s32.totalorder %s460_s18, 2  ;;  %s293_s14 = sand.u32 1, %s448_s15  }
  0xb7   : > { %s294_s27 = scalar_lea.sflag [#allocation3], %s293_s14 }
  0xb8   : > { %p355_p7 = pnand %p358_p4, %p530_p6 }
  0xba   : > { %p356_p8 = pneg %p355_p7 }
  0xbc   : > { %443 = dma.done.wait (%p356_p8), %s294_s27, 128  }
  0xbd   : > { %445 = vsyncadd (%p356_p8), %s294_s27, 4294967168  ;;  %p14_p9 = scmp.ge.s32.totalorder %s513_s21, 4   ;;  %s598_s15 = smov %s452_s16 }
  0xbe   : > { %s599_s16 = smov %s456_s17  ;;  %s600_s17 = smov %s524_s24 }
  0xbf   : > { %s601_s18 = smov %s513_s21  ;;  %16 = sbr.rel (!%p14_p9) target bundleno = 3 (0x3), region = 71 }
  0xc4   :  { %300 = vsyncpa [#allocation3], 1 }
  0xc5   :  { %302 = vsyncpa [#allocation3 + $0x1], 1 }

</bundles_post_ra>
